<compile_context>
chip_gen: v6e
topology: v6e:2x2x1
jax: 0.10.0
libtpu: 0.0.40
codegen_flags: <defaults>
</compile_context>

<pallas_src>
import math

import jax
import jax.numpy as jnp
from jax import lax
from jax.experimental import pallas as pl
from jax.experimental.pallas import tpu as pltpu

D_IN = 8
D_OUT = 16


def _attn_kernel(x_ref, w_ref, b_ref, o_ref):
    # x_ref: (B*S, D_IN)      -- whole (flattened) input, one grid step
    # w_ref: (D_IN, 3*D_OUT)  -- [Wq*scale | Wk | Wv], pre-transposed
    # b_ref: (1, 3*D_OUT)     -- [bq*scale | bk | bv]
    # o_ref: (B, S, D_OUT)
    batch, seq, d_out = o_ref.shape

    # Fused QKV projection: one MXU push.
    qkv = jnp.dot(x_ref[...], w_ref[...], preferred_element_type=jnp.float32)
    qkv = qkv + b_ref[...]

    q = qkv[:, :d_out]               # already scaled by 1/sqrt(d_out)
    k = qkv[:, d_out:2 * d_out]
    v = qkv[:, 2 * d_out:]

    # Tiny batch: unrolled at trace time (B=2).
    for b in range(batch):
        lo, hi = b * seq, (b + 1) * seq
        qb, kb, vb = q[lo:hi], k[lo:hi], v[lo:hi]

        # s = qb @ kb^T without materializing a transpose.
        s = lax.dot_general(qb, kb, (((1,), (1,)), ((), ())),
                            preferred_element_type=jnp.float32)

        # Softmax over the last axis (PyTorch Softmax(dim=2) on (B, S, S)).
        s = s - jnp.max(s, axis=-1, keepdims=True)
        p = jnp.exp(s)
        p = p * pl.reciprocal(jnp.sum(p, axis=-1, keepdims=True), approx=True)

        o_ref[b] = jnp.dot(p, vb, preferred_element_type=jnp.float32).astype(o_ref.dtype)


def attention_forward(x, wq, bq, wk, bk, wv, bv):
    B, S, _ = x.shape
    scale = 1.0 / math.sqrt(float(D_OUT))  # matches div(sqrt(16.)) in the spec

    # Fold the score scale into the query projection; pre-transpose + fuse QKV.
    w_qkv = jnp.concatenate([wq.T * scale, wk.T, wv.T], axis=1)      # (D_IN, 3*D_OUT)
    b_qkv = jnp.concatenate([bq * scale, bk, bv]).reshape(1, 3 * D_OUT)
    x2d = x.reshape(B * S, D_IN)

    return pl.pallas_call(
        _attn_kernel,
        out_shape=jax.ShapeDtypeStruct((B, S, D_OUT), jnp.float32),
        grid=(1,),
        in_specs=[
            pl.BlockSpec((B * S, D_IN), lambda i: (0, 0)),
            pl.BlockSpec((D_IN, 3 * D_OUT), lambda i: (0, 0)),
            pl.BlockSpec((1, 3 * D_OUT), lambda i: (0, 0)),
        ],
        out_specs=pl.BlockSpec((B, S, D_OUT), lambda i: (0, 0, 0)),
        compiler_params=pltpu.CompilerParams(
            dimension_semantics=("arbitrary",)
        ),
    )(x2d, w_qkv, b_qkv)


def _reference(x, wq, bq, wk, bk, wv, bv):
    q = x @ wq.T + bq
    k = x @ wk.T + bk
    v = x @ wv.T + bv
    s = jnp.einsum("bsd,btd->bst", q, k) / math.sqrt(float(D_OUT))
    p = jax.nn.softmax(s, axis=2)
    return jnp.einsum("bst,btd->bsd", p, v)


if __name__ == "__main__":
    key = jax.random.PRNGKey(0)
    kx, kq, kbq, kk, kbk, kv, kbv = jax.random.split(key, 7)

    B, S = 2, 8
    x = jax.random.normal(kx, (B, S, D_IN), dtype=jnp.float32)

    # Deterministic parameter init (PyTorch-Linear-like uniform bound 1/sqrt(fan_in)).
    bound = 1.0 / math.sqrt(D_IN)
    wq = jax.random.uniform(kq, (D_OUT, D_IN), jnp.float32, -bound, bound)
    bq = jax.random.uniform(kbq, (D_OUT,), jnp.float32, -bound, bound)
    wk = jax.random.uniform(kk, (D_OUT, D_IN), jnp.float32, -bound, bound)
    bk = jax.random.uniform(kbk, (D_OUT,), jnp.float32, -bound, bound)
    wv = jax.random.uniform(kv, (D_OUT, D_IN), jnp.float32, -bound, bound)
    bv = jax.random.uniform(kbv, (D_OUT,), jnp.float32, -bound, bound)

    out = attention_forward(x, wq, bq, wk, bk, wv, bv)
    out = jax.block_until_ready(out)

    ref = _reference(x, wq, bq, wk, bk, wv, bv)
    assert out.shape == (B, S, D_OUT)
    # Tolerance loosened for pl.reciprocal(approx=True) in the softmax denominator.
    assert jnp.allclose(out, ref, atol=2e-3, rtol=2e-3), "mismatch vs reference"

    print("KERNEL_OK")
</pallas_src>

<mosaic_0001>
module attributes {stable_mosaic.version = 11 : i64} {
  func.func @_attn_kernel(%arg0: i32, %arg1: memref<16x8xf32, #tpu.memory_space<vmem>>, %arg2: memref<8x48xf32, #tpu.memory_space<vmem>>, %arg3: memref<1x48xf32, #tpu.memory_space<vmem>>, %arg4: memref<2x8x16xf32, #tpu.memory_space<vmem>>) attributes {dimension_semantics = [#tpu.dimension_semantics<arbitrary>], iteration_bounds = array<i64: 1>, scalar_prefetch = 0 : i64, scratch_operands = 0 : i64, tpu.core_type = #tpu.core_type<tc>, window_params = [{pipeline_mode = #tpu.pipeline_mode<synchronous>, transform_indices = @transform_0, window_bounds = array<i64: 16, 8>}, {pipeline_mode = #tpu.pipeline_mode<synchronous>, transform_indices = @transform_1, window_bounds = array<i64: 8, 48>}, {pipeline_mode = #tpu.pipeline_mode<synchronous>, transform_indices = @transform_2, window_bounds = array<i64: 1, 48>}, {pipeline_mode = #tpu.pipeline_mode<synchronous>, transform_indices = @transform_3, window_bounds = array<i64: 2, 8, 16>}]} {
    %c0 = arith.constant 0 : index
    %c0_0 = arith.constant 0 : index
    %0 = vector.load %arg1[%c0, %c0_0] : memref<16x8xf32, #tpu.memory_space<vmem>>, vector<16x8xf32>
    %c0_1 = arith.constant 0 : index
    %c0_2 = arith.constant 0 : index
    %1 = vector.load %arg2[%c0_1, %c0_2] : memref<8x48xf32, #tpu.memory_space<vmem>>, vector<8x48xf32>
    %cst = arith.constant dense<0.000000e+00> : vector<16x48xf32>
    %2 = tpu.matmul %0, %1, %cst {dimension_numbers = #tpu.dot_dimension_numbers<[1], [0], [0], [1], [0, 0, 1, 1], [], []>} : vector<16x8xf32>, vector<8x48xf32>, vector<16x48xf32> -> vector<16x48xf32>
    %c0_3 = arith.constant 0 : index
    %c0_4 = arith.constant 0 : index
    %3 = vector.load %arg3[%c0_3, %c0_4] : memref<1x48xf32, #tpu.memory_space<vmem>>, vector<1x48xf32>
    %4 = vector.broadcast %3 : vector<1x48xf32> to vector<16x48xf32>
    %5 = arith.addf %2, %4 : vector<16x48xf32>
    %6 = vector.extract_strided_slice %5 {offsets = [0, 0], sizes = [16, 16], strides = [1, 1]} : vector<16x48xf32> to vector<16x16xf32>
    %7 = vector.extract_strided_slice %5 {offsets = [0, 16], sizes = [16, 16], strides = [1, 1]} : vector<16x48xf32> to vector<16x16xf32>
    %8 = vector.extract_strided_slice %5 {offsets = [0, 32], sizes = [16, 16], strides = [1, 1]} : vector<16x48xf32> to vector<16x16xf32>
    %9 = vector.extract_strided_slice %6 {offsets = [0, 0], sizes = [8, 16], strides = [1, 1]} : vector<16x16xf32> to vector<8x16xf32>
    %10 = vector.extract_strided_slice %7 {offsets = [0, 0], sizes = [8, 16], strides = [1, 1]} : vector<16x16xf32> to vector<8x16xf32>
    %11 = vector.extract_strided_slice %8 {offsets = [0, 0], sizes = [8, 16], strides = [1, 1]} : vector<16x16xf32> to vector<8x16xf32>
    %cst_5 = arith.constant dense<0.000000e+00> : vector<8x8xf32>
    %12 = tpu.matmul %9, %10, %cst_5 {dimension_numbers = #tpu.dot_dimension_numbers<[1], [1], [0], [0], [0, 0, 1, 0], [], []>} : vector<8x16xf32>, vector<8x16xf32>, vector<8x8xf32> -> vector<8x8xf32>
    %cst_6 = arith.constant dense<0xFF800000> : vector<8xf32>
    %13 = vector.multi_reduction <maximumf>, %12, %cst_6 [1] : vector<8x8xf32> to vector<8xf32>
    %14 = vector.shape_cast %13 : vector<8xf32> to vector<8x1xf32>
    %15 = vector.broadcast %14 : vector<8x1xf32> to vector<8x8xf32>
    %16 = arith.subf %12, %15 : vector<8x8xf32>
    %17 = math.exp %16 : vector<8x8xf32>
    %cst_7 = arith.constant dense<0.000000e+00> : vector<8xf32>
    %18 = vector.multi_reduction <add>, %17, %cst_7 [1] : vector<8x8xf32> to vector<8xf32>
    %19 = vector.shape_cast %18 : vector<8xf32> to vector<8x1xf32>
    %20 = tpu.reciprocal %19 {approx = true} : vector<8x1xf32> -> vector<8x1xf32>
    %21 = vector.broadcast %20 : vector<8x1xf32> to vector<8x8xf32>
    %22 = arith.mulf %17, %21 : vector<8x8xf32>
    %cst_8 = arith.constant dense<0.000000e+00> : vector<8x16xf32>
    %23 = tpu.matmul %22, %11, %cst_8 {dimension_numbers = #tpu.dot_dimension_numbers<[1], [0], [0], [1], [0, 0, 1, 1], [], []>} : vector<8x8xf32>, vector<8x16xf32>, vector<8x16xf32> -> vector<8x16xf32>
    %c0_9 = arith.constant 0 : index
    %c0_10 = arith.constant 0 : index
    %c0_11 = arith.constant 0 : index
    %24 = vector.load %arg4[%c0_9, %c0_10, %c0_11] : memref<2x8x16xf32, #tpu.memory_space<vmem>>, vector<1x8x16xf32>
    %25 = vector.shape_cast %24 : vector<1x8x16xf32> to vector<8x16xf32>
    %26 = vector.shape_cast %23 : vector<8x16xf32> to vector<1x8x16xf32>
    tpu.vector_store %arg4[%c0_9, %c0_10, %c0_11], %26 {strides = array<i32>} : memref<2x8x16xf32, #tpu.memory_space<vmem>>, vector<1x8x16xf32>,
    %27 = vector.extract_strided_slice %6 {offsets = [8, 0], sizes = [8, 16], strides = [1, 1]} : vector<16x16xf32> to vector<8x16xf32>
    %28 = vector.extract_strided_slice %7 {offsets = [8, 0], sizes = [8, 16], strides = [1, 1]} : vector<16x16xf32> to vector<8x16xf32>
    %29 = vector.extract_strided_slice %8 {offsets = [8, 0], sizes = [8, 16], strides = [1, 1]} : vector<16x16xf32> to vector<8x16xf32>
    %cst_12 = arith.constant dense<0.000000e+00> : vector<8x8xf32>
    %30 = tpu.matmul %27, %28, %cst_12 {dimension_numbers = #tpu.dot_dimension_numbers<[1], [1], [0], [0], [0, 0, 1, 0], [], []>} : vector<8x16xf32>, vector<8x16xf32>, vector<8x8xf32> -> vector<8x8xf32>
    %cst_13 = arith.constant dense<0xFF800000> : vector<8xf32>
    %31 = vector.multi_reduction <maximumf>, %30, %cst_13 [1] : vector<8x8xf32> to vector<8xf32>
    %32 = vector.shape_cast %31 : vector<8xf32> to vector<8x1xf32>
    %33 = vector.broadcast %32 : vector<8x1xf32> to vector<8x8xf32>
    %34 = arith.subf %30, %33 : vector<8x8xf32>
    %35 = math.exp %34 : vector<8x8xf32>
    %cst_14 = arith.constant dense<0.000000e+00> : vector<8xf32>
    %36 = vector.multi_reduction <add>, %35, %cst_14 [1] : vector<8x8xf32> to vector<8xf32>
    %37 = vector.shape_cast %36 : vector<8xf32> to vector<8x1xf32>
    %38 = tpu.reciprocal %37 {approx = true} : vector<8x1xf32> -> vector<8x1xf32>
    %39 = vector.broadcast %38 : vector<8x1xf32> to vector<8x8xf32>
    %40 = arith.mulf %35, %39 : vector<8x8xf32>
    %cst_15 = arith.constant dense<0.000000e+00> : vector<8x16xf32>
    %41 = tpu.matmul %40, %29, %cst_15 {dimension_numbers = #tpu.dot_dimension_numbers<[1], [0], [0], [1], [0, 0, 1, 1], [], []>} : vector<8x8xf32>, vector<8x16xf32>, vector<8x16xf32> -> vector<8x16xf32>
    %c1 = arith.constant 1 : index
    %c0_16 = arith.constant 0 : index
    %c0_17 = arith.constant 0 : index
    %42 = vector.load %arg4[%c1, %c0_16, %c0_17] : memref<2x8x16xf32, #tpu.memory_space<vmem>>, vector<1x8x16xf32>
    %43 = vector.shape_cast %42 : vector<1x8x16xf32> to vector<8x16xf32>
    %44 = vector.shape_cast %41 : vector<8x16xf32> to vector<1x8x16xf32>
    tpu.vector_store %arg4[%c1, %c0_16, %c0_17], %44 {strides = array<i32>} : memref<2x8x16xf32, #tpu.memory_space<vmem>>, vector<1x8x16xf32>,
    return
  }
  func.func @transform_0(%arg0: i32) -> (i32, i32) {
    %c0_i32 = arith.constant 0 : i32
    %c0_i32_0 = arith.constant 0 : i32
    %c0_i32_1 = arith.constant 0 : i32
    return %c0_i32, %c0_i32_0 : i32, i32
  }
  func.func @transform_1(%arg0: i32) -> (i32, i32) {
    %c0_i32 = arith.constant 0 : i32
    %c0_i32_0 = arith.constant 0 : i32
    %c0_i32_1 = arith.constant 0 : i32
    return %c0_i32, %c0_i32_0 : i32, i32
  }
  func.func @transform_2(%arg0: i32) -> (i32, i32) {
    %c0_i32 = arith.constant 0 : i32
    %c0_i32_0 = arith.constant 0 : i32
    %c0_i32_1 = arith.constant 0 : i32
    return %c0_i32, %c0_i32_0 : i32, i32
  }
  func.func @transform_3(%arg0: i32) -> (i32, i32, i32) {
    %c0_i32 = arith.constant 0 : i32
    %c0_i32_0 = arith.constant 0 : i32
    %c0_i32_1 = arith.constant 0 : i32
    %c0_i32_2 = arith.constant 0 : i32
    return %c0_i32, %c0_i32_0, %c0_i32_1 : i32, i32, i32
  }
}

</mosaic_0001>

<bundles_post_ra>
// kernel: tpu_custom_call.1
= control target key start
LH: loop header
LB: loop body
LE: loop exit
PB: predicated region body
PF: predicated region fallthrough
CT: control target
= control target key end

     0   :  { %vm25_vm0 = vcmask 64512   ;;  %s597_s0 = inlined_call_operand.vmem [shape: f32[16,8], index: 0, kind: input, shape index: {}]   ;;  %s598_s1 = inlined_call_operand.vmem [shape: f32[8,48], index: 1, kind: input, shape index: {}]   ;;  %s599_s2 = inlined_call_operand.vmem [shape: f32[1,48], index: 2, kind: input, shape index: {}]   ;;  %s600_s3 = inlined_call_operand.hbm [shape: f32[2,8,16], index: 3, kind: output, shape index: {}]  }
   0x1   :  { %v17_v0 = vld [vmem:[%s598_s1] sm:$0xff]  ;;  %v16_v2 = vld [vmem:[%s597_s0 + $0x8] sm:$0xff] }
   0x2   :  { %v15_v1 = vld [vmem:[%s597_s0] sm:$0xff]  ;;  %475 = vmatprep.subr.mxu0 %v17_v0 }
   0x3   :  { %477 = vmatprep.mubr.msk.f32.mxu0 %vm25_vm0, %v15_v1 }
   0x4   :  { %8 = vsyncpa [#allocation3], 0  ;;  %476 = vmatpush3.msra.mxu0 %v17_v0  ;;  %v537_v3 = vmov 0.0   ;;  %vm538_vm1 = vmmov 0   ;;  %v455_v5 = vld [vmem:[%s599_s2] ss:$0 sm:$0xff] }
   0x5   :  { %478 = vmatmul.mubr.msk.f32.vlgmr.msra.gmra.mxu0 %vm25_vm0, %v16_v2  ;;  %480 = vmatprep.subr.mxu1 %v537_v3  ;;  %s539_s0 = smov 112   ;;  %vm110_vm2 = vcmask 130048   ;;  %s540_s2 = smov 96  }
   0x6   :  { %485 = vmatprep.subr.mxu0 %v537_v3  ;;  %482 = vmatprep.mubr.msk.f32.mxu1 %vm538_vm1, %v537_v3  ;;  %s541_s19 = smov [#allocation2]  }
   0x7   :  { %487 = vmatprep.mubr.msk.f32.mxu0 %vm538_vm1, %v537_v3  ;;  %s444_s20 = sshll.u32 %s541_s19, 4  ;;  %s445_s20 = int_to_ptr.vmem [resolvable:$true] %s444_s20 }
   0x8   :  { %s515_s21 = scalar_lea.vmem %s445_s20, 256  ;;  %p520_p1 = scmp.lt.s32.totalorder %s445_s20, %s445_s20 }
   0x9   :  { %p516_p0 = scmp.ne.s32.totalorder %s445_s20, %s515_s21  ;;  %p521_p2 = scmp.lt.s32.totalorder %s515_s21, %s515_s21 }
   0xb   :  { %p522_p3 = por %p521_p2, %p520_p1 }
   0xd   :  { %p523_p4 = pnand %p522_p3, %p516_p0 }
  0xc5   :  { %v479_v4 = vpop.f32.mrf.mxu0 }
  0xc6   :  { %v104_v8 = vadd.f32 %v479_v4, %v455_v5 }
  0xc7   :  { %v98_v6 = vpop.f32.mrf.mxu0 }
  0xc8   :  { %v99_v7 = vadd.f32 %v455_v5, %v98_v6 }
  0xca   :  { %108 = vrot.lane.b32.xlu0 %v99_v7, %s539_s0 }
  0xce   :  { %274 = vrot.lane.b32.xlu0 %v104_v8, %s539_s0 }
 0x13c   :  { %v109_v9 = vpop.permute.xlu0 %108 }
 0x13d   :  { %481 = vmatpush3.xpose.msk.msra.mxu1 %vm110_vm2, %v109_v9 }
 0x13e   :  { %490 = vmatprep.subr.mxu1 %v537_v3 }
 0x140   :  { %483 = vmatmul.mubr.msk.f32.vlgmr.msra.gmra.mxu1 %vm110_vm2, %v99_v7  ;;  %v275_v10 = vpop.permute.xlu0 %274 }
 0x141   :  { %491 = vmatpush3.xpose.msk.msra.mxu1 %vm110_vm2, %v275_v10  ;;  %492 = vmatprep.mubr.msk.f32.mxu1 %vm538_vm1, %v537_v3 }
 0x144   :  { %493 = vmatmul.mubr.msk.f32.vlgmr.msra.gmra.mxu1 %vm110_vm2, %v104_v8 }
 0x200   :  { %v181_v11 = vpop.f32.mrf.mxu1 }
 0x201   :  { %v185_v12 = vsel %vm25_vm0, %v181_v11, -inf }
 0x202   :  { %186 = vmax.xlane.f32.xlu1 %v185_v12  ;;  %v484_v13 = vpop.f32.mrf.mxu1 }
 0x204   :  { %v346_v14 = vpop.f32.mrf.mxu1 }
 0x205   :  { %v350_v15 = vsel %vm25_vm0, %v346_v14, -inf }
 0x206   :  { %351 = vmax.xlane.f32.xlu1 %v350_v15  ;;  %v494_v16 = vpop.f32.mrf.mxu1 }
 0x217   :  { %196 = vrot.lane.b32.xlu1 %v99_v7, %s540_s2 }
 0x28b   :  { %v187_v17 = vpop.xlane.xlu1 %186 }
 0x28c   :  { %v188_v18 = vsub.f32 %v181_v11, %v187_v17 }
 0x28e   :  { %v189_v19 = vmul.f32 1.442695, %v188_v18 }
 0x28f   :  { %v352_v20 = vpop.xlane.xlu1 %351 }
 0x290   :  { %507 = vpow2.f32 %v189_v19  ;;  %v353_v21 = vsub.f32 %v346_v14, %v352_v20 }
 0x292   :  { %v354_v22 = vmul.f32 1.442695, %v353_v21 }
 0x293   :  { %v197_v23 = vpop.permute.xlu1 %196 }
 0x294   :  { %509 = vpow2.f32 %v354_v22  ;;  %486 = vmatpush3.msra.mxu0 %v197_v23 }
 0x295   :  { %495 = vmatprep.subr.mxu0 %v537_v3 }
 0x29d   :  { %v508_v24 = vpop.eup %507 }
 0x29e   :  { %v191_v25 = vsel %vm25_vm0, %v508_v24, 0.0 }
 0x29f   :  { %192 = vadd.xlane.f32.xlu0 %v191_v25 }
 0x2a1   :  { %v510_v26 = vpop.eup %509 }
 0x2a2   :  { %v356_v27 = vsel %vm25_vm0, %v510_v26, 0.0 }
 0x2a3   :  { %357 = vadd.xlane.f32.xlu1 %v356_v27 }
 0x2b4   :  { %361 = vrot.lane.b32.xlu1 %v104_v8, %s540_s2 }
 0x328   :  { %v193_v28 = vpop.xlane.xlu0 %192 }
 0x329   :  { %511 = vrcp.f32 %v193_v28 }
 0x32c   :  { %v358_v29 = vpop.xlane.xlu1 %357 }
 0x32d   :  { %513 = vrcp.f32 %v358_v29 }
 0x330   :  { %v362_v32 = vpop.permute.xlu1 %361 }
 0x336   :  { %v512_v30 = vpop.eup %511 }
 0x337   :  { %v195_v31 = vmul.f32 %v512_v30, %v508_v24 }
 0x339   :  { %488 = vmatmul.mubr.msk.f32.vlgmr.msra.gmra.mxu0 %vm25_vm0, %v195_v31 }
 0x33a   :  { %v514_v33 = vpop.eup %513  ;;  %496 = vmatpush3.msra.mxu0 %v362_v32  ;;  %497 = vmatprep.mubr.msk.f32.mxu0 %vm538_vm1, %v537_v3 }
 0x33b   :  { %v360_v34 = vmul.f32 %v514_v33, %v510_v26 }
 0x33d   :  { %498 = vmatmul.mubr.msk.f32.vlgmr.msra.gmra.mxu0 %vm25_vm0, %v360_v34 }
 0x3f9   :  { %v268_v35 = vpop.f32.mrf.mxu0 }
 0x3fa   :  { %272 = vst.msk [vmem:[#allocation2] sm:$0xff] %vm110_vm2, %v268_v35 }
 0x3fb   :  { %v489_v36 = vpop.f32.mrf.mxu0 }
 0x3fd   :  { %v433_v37 = vpop.f32.mrf.mxu0 }
 0x3fe   :  { %438 = vst.msk [vmem:[#allocation2 + $0x8] sm:$0xff] %vm110_vm2, %v433_v37 }
 0x3ff   :  { %v499_v38 = vpop.f32.mrf.mxu0 }
 0x400   :  { %526 = shalt.err (!%p523_p4)
}
 0x401   :  { %s542_s22 = smov 128   ;;  %s543_s23 = smov 8  }
 0x402   :  { %450 = dma.vmem_to_hbm [thread:$0]  %s445_s20, 256, %s600_s3, [#allocation3], %s542_s22, %s542_s22, %s543_s23  }
 0x403   :  { %535 = dma.done.wait [#allocation3], 256  }
 0x404   :  { %536 = vsyncadd [#allocation3], 4294967040 }
 0x405   :  { %454 = vsyncpa [#allocation3], 1 }

</bundles_post_ra>
